<compile_context>
chip_gen: v7x
topology: tpu7x:2x2x1
jax: 0.10.0
libtpu: 0.0.40
codegen_flags: <defaults>
</compile_context>

<pallas_src>
import jax
import jax.numpy as jnp
from jax.experimental import pallas as pl
from jax.experimental.pallas import tpu as pltpu

EPS_BN = 1e-5
ACT_DTYPE = jnp.bfloat16          # storage dtype for intermediate activations

CONFIG = {
    "kpt_n": 5000,
    "score_thld": 0.5,
    "edge_thld": 10,
    "nms_size": 3,
    "eof_size": 5,
}


# ----------------------------------------------------------------------------
# small helpers
# ----------------------------------------------------------------------------
def _round_up(x, m):
    return (x + m - 1) // m * m


def _full_spec(shape):
    zeros = (0,) * len(shape)
    return pl.BlockSpec(shape, lambda i: zeros)


def _softplus(x):
    # matches F.softplus(beta=1, threshold=20)
    return jnp.where(x > 20.0, x, jnp.log(1.0 + jnp.exp(jnp.minimum(x, 20.0))))


def _pick_cap(width, bytes_per=2, budget=4 * 1024 * 1024, lo=1024, hi=8192):
    # largest power-of-two row-tile (<= hi) keeping a (tile, width) block <= budget
    cap = lo
    while cap < hi and (cap * 2) * width * bytes_per <= budget:
        cap *= 2
    return cap


def _largest_divisor_tile(n, cap):
    # largest multiple of 8 that divides n and is <= cap (n is a multiple of 8)
    t = min(cap, n) // 8 * 8
    while t > 8 and n % t:
        t -= 8
    return max(t, 8)


def _im2col(x, k=3, stride=1):
    # x: (B, H, W, C) bf16 -> (B, Ho, Wo, k*k*C); zero padding (k-1)//2.
    # Stride is applied inside the per-tap slices so stride-2 layers never
    # materialize the full-resolution patch tensor.
    # TODO(synk): fuse the 3x3 window into the matmul kernel (halo-tiled row
    # blocks over the raw feature map) to avoid the 9x patch matrix entirely.
    B, H, W, C = x.shape
    p = (k - 1) // 2
    xp = jnp.pad(x, ((0, 0), (p, p), (p, p), (0, 0)))
    cols = [xp[:, ky:ky + H:stride, kx:kx + W:stride, :]
            for ky in range(k) for kx in range(k)]
    return jnp.concatenate(cols, axis=-1)


# ----------------------------------------------------------------------------
# conv hot path: bf16 MXU matmul, full-K / full-N blocks, grid over M tiles.
# Optionally emits per-tile column (sum, sumsq) stats for the fused BN path.
# ----------------------------------------------------------------------------
def _conv_mm_stats_kernel(act):
    def kernel(x_ref, w_ref, o_ref, s_ref):
        y = jnp.dot(x_ref[...], w_ref[...], preferred_element_type=jnp.float32)
        if act == "relu":
            y = jnp.maximum(y, 0.0)
        o_ref[...] = y.astype(o_ref.dtype)
        stats = jnp.concatenate(
            [jnp.sum(y, axis=0, keepdims=True),
             jnp.sum(y * y, axis=0, keepdims=True)], axis=0)     # (2, N)
        s_ref[...] = stats[None]                                  # (1, 2, N)
    return kernel


def _conv_mm_kernel(act):
    def kernel(x_ref, w_ref, o_ref):
        y = jnp.dot(x_ref[...], w_ref[...], preferred_element_type=jnp.float32)
        if act == "relu":
            y = jnp.maximum(y, 0.0)
        o_ref[...] = y.astype(o_ref.dtype)
    return kernel


def matmul_conv(xm, wm, act=None, out_dtype=ACT_DTYPE, collect_stats=False):
    # xm: (M, K), wm: (K, N) with N <= 128.  Returns the M-padded (m_pad, N)
    # output (and, optionally, (grid_m, 2, N) f32 column sum/sumsq stats).
    M, K = xm.shape
    _, N = wm.shape
    cap = _pick_cap(K)
    m8 = _round_up(M, 8)
    if m8 <= cap:
        tm = m8
    else:
        tm = _largest_divisor_tile(m8, cap)
        if tm < 256:                       # no good divisor: pad M to the cap
            tm = cap
    m_pad = _round_up(m8, tm)

    xp = xm.astype(jnp.bfloat16)
    if m_pad != M:
        xp = jnp.pad(xp, ((0, m_pad - M), (0, 0)))
    wp = wm.astype(jnp.bfloat16)
    grid_m = m_pad // tm

    x_spec = pl.BlockSpec((tm, K), lambda i: (i, 0))
    w_spec = pl.BlockSpec((K, N), lambda i: (0, 0))
    y_spec = pl.BlockSpec((tm, N), lambda i: (i, 0))
    cparams = pltpu.CompilerParams(dimension_semantics=("parallel",),
                                   vmem_limit_bytes=32 * 1024 * 1024)

    if collect_stats:
        y, stats = pl.pallas_call(
            _conv_mm_stats_kernel(act),
            out_shape=(jax.ShapeDtypeStruct((m_pad, N), out_dtype),
                       jax.ShapeDtypeStruct((grid_m, 2, N), jnp.float32)),
            grid=(grid_m,),
            in_specs=[x_spec, w_spec],
            out_specs=(y_spec, pl.BlockSpec((1, 2, N), lambda i: (i, 0, 0))),
            compiler_params=cparams,
        )(xp, wp)
        return y, stats

    y = pl.pallas_call(
        _conv_mm_kernel(act),
        out_shape=jax.ShapeDtypeStruct((m_pad, N), out_dtype),
        grid=(grid_m,),
        in_specs=[x_spec, w_spec],
        out_specs=y_spec,
        compiler_params=cparams,
    )(xp, wp)
    return y


# ----------------------------------------------------------------------------
# BatchNorm apply (affine=False, batch statistics) + optional ReLU.
# Stats come from the matmul epilogue; only the normalize pass touches HBM.
# The channel axis keeps its native width (no padding to 128).
# ----------------------------------------------------------------------------
def _bn_apply_kernel(relu):
    def kernel(x_ref, mi_ref, o_ref):
        y = (x_ref[...].astype(jnp.float32) - mi_ref[0:1, :]) * mi_ref[1:2, :]
        if relu:
            y = jnp.maximum(y, 0.0)
        o_ref[...] = y.astype(o_ref.dtype)
    return kernel


def bn_apply(y_pad, stats, count, relu, out_dtype=ACT_DTYPE):
    # y_pad: (m_pad, C); stats: (grid_m, 2, C) f32; count = true row count.
    # Note: BatchNorm2d(track_running_stats=False) uses batch statistics at
    # inference, so computing them here matches the PyTorch module.
    s = jnp.sum(stats, axis=0)                       # (2, C)
    mean = s[0:1] / count
    var = jnp.maximum(s[1:2] / count - mean * mean, 0.0)
    inv = jax.lax.rsqrt(var + EPS_BN)
    mi = jnp.concatenate([mean, inv], axis=0)        # (2, C) f32

    m_pad, C = y_pad.shape
    cap = _pick_cap(C)
    tm = m_pad if m_pad <= cap else _largest_divisor_tile(m_pad, cap)

    return pl.pallas_call(
        _bn_apply_kernel(relu),
        out_shape=jax.ShapeDtypeStruct((m_pad, C), out_dtype),
        grid=(m_pad // tm,),
        in_specs=[pl.BlockSpec((tm, C), lambda i: (i, 0)),
                  pl.BlockSpec((2, C), lambda i: (0, 0))],
        out_specs=pl.BlockSpec((tm, C), lambda i: (i, 0)),
        compiler_params=pltpu.CompilerParams(
            dimension_semantics=("parallel",),
            vmem_limit_bytes=32 * 1024 * 1024),
    )(y_pad, mi)


# ----------------------------------------------------------------------------
# conv layer = im2col (bf16) + matmul (+ fused stats) [+ BN apply (+ReLU)]
# ----------------------------------------------------------------------------
def conv_layer(x, w_hwio, stride=1, mode="bn_relu"):
    # mode: "bn_relu" -> conv, BN, ReLU; "relu" -> conv, ReLU (returns the
    # activation AND its separate BN for the next layer); "plain" -> conv only.
    kh, kw, cin, cout = w_hwio.shape
    patches = _im2col(x, k=kh, stride=stride)
    B, Ho, Wo, K = patches.shape
    M = B * Ho * Wo
    xm = patches.reshape(M, K)
    wm = w_hwio.reshape(kh * kw * cin, cout)

    if mode == "plain":
        y = matmul_conv(xm, wm, act=None, out_dtype=jnp.float32)
        return y[:M].reshape(B, Ho, Wo, cout)

    act = "relu" if mode == "relu" else None
    y_pad, stats = matmul_conv(xm, wm, act=act, out_dtype=ACT_DTYPE,
                               collect_stats=True)
    if mode == "bn_relu":
        y_bn = bn_apply(y_pad, stats, float(M), relu=True)
        return y_bn[:M].reshape(B, Ho, Wo, cout)

    # mode == "relu": x_act feeds peakiness, bn(x_act) feeds the next conv.
    x_act = y_pad[:M].reshape(B, Ho, Wo, cout)
    x_bn = bn_apply(y_pad, stats, float(M), relu=False)[:M].reshape(B, Ho, Wo, cout)
    return x_act, x_bn


# ----------------------------------------------------------------------------
# clf head: fused desc**2 * (w1 - w0) reduction + 2-class softmax (= sigmoid)
# ----------------------------------------------------------------------------
def _clf_kernel(x_ref, w_ref, b_ref, o_ref):
    xs = x_ref[...].astype(jnp.float32)
    diff = jnp.sum(xs * xs * w_ref[...], axis=-1) + b_ref[...]
    o_ref[...] = jax.nn.sigmoid(diff)   # softmax([l0, l1])[1] == sigmoid(l1 - l0)


def clf_conf_pallas(desc, w, b):
    # desc: (h6, w6, 128) f32; w: (128, 2); b: (2,). Returns conf (h6, w6) f32.
    h6, w6, C = desc.shape
    th = min(_round_up(h6, 8), 64)
    h6p = _round_up(h6, th)
    dp = desc if h6p == h6 else jnp.pad(desc, ((0, h6p - h6), (0, 0), (0, 0)))
    wdiff = (w[:, 1] - w[:, 0]).reshape(1, 1, C).astype(jnp.float32)
    bdiff = (b[1] - b[0]).reshape(1, 1).astype(jnp.float32)

    out = pl.pallas_call(
        _clf_kernel,
        out_shape=jax.ShapeDtypeStruct((h6p, w6), jnp.float32),
        grid=(h6p // th,),
        in_specs=[pl.BlockSpec((th, w6, C), lambda i: (i, 0, 0)),
                  pl.BlockSpec((1, 1, C), lambda i: (0, 0, 0)),
                  pl.BlockSpec((1, 1), lambda i: (0, 0))],
        out_specs=pl.BlockSpec((th, w6), lambda i: (i, 0)),
        compiler_params=pltpu.CompilerParams(
            dimension_semantics=("parallel",)),
    )(dp, wdiff, bdiff)
    return out[:h6]


# ----------------------------------------------------------------------------
# peakiness score (moving_instance_max == 1.0), row-tiled with a halo band.
# The reflect-padded map stays in HBM; each grid step DMAs its row band.
# ----------------------------------------------------------------------------
def peakiness_pallas(x, dilation, row_tile=16):
    _, h, w, C = x.shape
    d = dilation
    xpad = jnp.pad(x[0], ((d, d), (d, d), (0, 0)), mode="reflect")
    th = min(_round_up(h, 8), row_tile)
    h_pad = _round_up(h, th)
    if h_pad > h:
        xpad = jnp.pad(xpad, ((0, h_pad - h), (0, 0), (0, 0)))
    rows = th + 2 * d
    wp = w + 2 * d

    def kernel(xp_hbm, o_ref, buf, sem):
        start = pl.multiple_of(pl.program_id(0) * th, 8)
        cp = pltpu.make_async_copy(xp_hbm.at[pl.ds(start, rows)], buf, sem)
        cp.start()
        cp.wait()
        # TODO(synk): double-buffer the row-band DMA to overlap with compute.
        xp = buf[...].astype(jnp.float32)   # f32 compute (v5e has no bf16 VPU/EUP)
        xv = xp[d:d + th, d:d + w, :]
        avg = jnp.zeros((th, w, C), jnp.float32)
        for ky in range(3):
            for kx in range(3):
                avg = avg + xp[ky * d:ky * d + th, kx * d:kx * d + w, :]
        avg = avg * (1.0 / 9.0)
        cmean = jnp.mean(xv, axis=-1, keepdims=True)
        alpha = _softplus(xv - avg)
        beta = _softplus(xv - cmean)
        o_ref[...] = jnp.max(alpha * beta, axis=-1)

    out = pl.pallas_call(
        kernel,
        out_shape=jax.ShapeDtypeStruct((h_pad, w), jnp.float32),
        grid=(h_pad // th,),
        in_specs=[pl.BlockSpec(memory_space=pl.ANY)],
        out_specs=pl.BlockSpec((th, w), lambda i: (i, 0)),
        scratch_shapes=[pltpu.VMEM((rows, wp, C), x.dtype),
                        pltpu.SemaphoreType.DMA],
        compiler_params=pltpu.CompilerParams(
            dimension_semantics=("parallel",),
            vmem_limit_bytes=32 * 1024 * 1024),
    )(xpad)
    return out[:h][None]


# ----------------------------------------------------------------------------
# fused NMS + score threshold + eof border + edge (Hessian) mask
# ----------------------------------------------------------------------------
def mask_pallas(s, score_thld, edge_thld, nms_size, eof_size):
    # Single zero-padded copy (pad = edge dilation = 3) supplies both the NMS
    # window and the Hessian taps.  Zero padding is equivalent to -inf max-pool
    # padding because only pixels with score > score_thld (> 0) can pass, and
    # the eof border strips the rim anyway.  The NMS max is separable.
    H, W = s.shape
    d = 3
    spz = jnp.pad(s, ((d, d), (d, d)))
    thr = (edge_thld + 1) ** 2 / edge_thld
    r = nms_size // 2

    def kernel(spz_ref, o_ref):
        spzv = spz_ref[...]
        sv = spzv[d:d + H, d:d + W]

        # separable (2r+1)x(2r+1) max pool: rows then columns
        hm = spzv[d - r:d + r + H, d - r:d - r + W]
        for dx in range(-r + 1, r + 1):
            hm = jnp.maximum(hm, spzv[d - r:d + r + H, d + dx:d + dx + W])
        m = hm[0:H, :]
        for dy in range(1, 2 * r + 1):
            m = jnp.maximum(m, hm[dy:dy + H, :])
        mask = (sv == m) & (sv > score_thld)

        ii = jax.lax.broadcasted_iota(jnp.int32, (H, W), 0)
        jj = jax.lax.broadcasted_iota(jnp.int32, (H, W), 1)
        eof = ((ii >= eof_size) & (ii < H - eof_size) &
               (jj >= eof_size) & (jj < W - eof_size))
        mask = mask & eof

        def tap(dy, dx):
            return spzv[d + dy:d + dy + H, d + dx:d + dx + W]

        dii = tap(-d, 0) - 2.0 * sv + tap(d, 0)
        djj = tap(0, -d) - 2.0 * sv + tap(0, d)
        dij = 0.25 * (tap(-d, -d) - tap(-d, d) - tap(d, -d) + tap(d, d))
        det = dii * djj - dij * dij
        tr = dii + djj
        safe_det = jnp.where(det > 0.0, det, 1.0)
        ratio = jnp.where(det > 0.0, tr * tr / safe_det, jnp.inf)
        mask = mask & (ratio <= thr) & (det > 0.0)

        o_ref[...] = jnp.where(mask, sv, -jnp.inf)

    return pl.pallas_call(
        kernel,
        out_shape=jax.ShapeDtypeStruct((H, W), jnp.float32),
        grid=(1,),
        in_specs=[_full_spec(spz.shape)],
        out_specs=_full_spec((H, W)),
        compiler_params=pltpu.CompilerParams(
            vmem_limit_bytes=32 * 1024 * 1024),
    )(spz)


# ----------------------------------------------------------------------------
# glue: bilinear resize via gather+lerp (align_corners=True), keypoint gather
# ----------------------------------------------------------------------------
def _axis_lerp_idx(n_in, n_out):
    if n_in == 1 or n_out == 1:
        i0 = jnp.zeros((n_out,), jnp.int32)
        return i0, i0, jnp.zeros((n_out,), jnp.float32)
    src = jnp.arange(n_out, dtype=jnp.float32) * ((n_in - 1) / (n_out - 1))
    i0 = jnp.clip(jnp.floor(src), 0, n_in - 1).astype(jnp.int32)
    i1 = jnp.minimum(i0 + 1, n_in - 1)
    f = src - i0.astype(jnp.float32)
    return i0, i1, f


def bilinear_resize(x, H_out, W_out):
    # x: (B, h, w) -> (B, H_out, W_out), bilinear, align_corners=True
    _, h, w = x.shape
    if h == H_out and w == W_out:
        return x
    i0, i1, fi = _axis_lerp_idx(h, H_out)
    j0, j1, fj = _axis_lerp_idx(w, W_out)
    rows = (x[:, i0, :] * (1.0 - fi)[None, :, None]
            + x[:, i1, :] * fi[None, :, None])
    out = (rows[:, :, j0] * (1.0 - fj)[None, None, :]
           + rows[:, :, j1] * fj[None, None, :])
    return out


def bilinear_gather(pos, feat):
    # pos: (k, 2) float (i, j); feat: (h, w, C)
    h, w, _ = feat.shape
    i, j = pos[:, 0], pos[:, 1]
    i0 = jnp.clip(jnp.floor(i).astype(jnp.int32), 0, h - 1)
    j0 = jnp.clip(jnp.floor(j).astype(jnp.int32), 0, w - 1)
    i1 = jnp.clip(jnp.ceil(i).astype(jnp.int32), 0, h - 1)
    j1 = jnp.clip(jnp.ceil(j).astype(jnp.int32), 0, w - 1)
    di = i - i0.astype(jnp.float32)
    dj = j - j0.astype(jnp.float32)
    w_tl = ((1 - di) * (1 - dj))[:, None]
    w_tr = ((1 - di) * dj)[:, None]
    w_bl = (di * (1 - dj))[:, None]
    w_br = (di * dj)[:, None]
    return (w_tl * feat[i0, j0] + w_tr * feat[i0, j1] +
            w_bl * feat[i1, j0] + w_br * feat[i1, j1])


# ----------------------------------------------------------------------------
# parameters (deterministic synthetic init; no checkpoint load)
# ----------------------------------------------------------------------------
_CONV_DEFS = [
    # name,      cin, cout, stride, mode
    ("conv0",      3,  32, 1, "bn_relu"),
    ("conv1",     32,  32, 1, "relu"),      # bn1 applied separately (after ReLU)
    ("conv2",     32,  64, 2, "bn_relu"),
    ("conv3",     64,  64, 1, "relu"),      # bn3 applied separately
    ("conv4",     64, 128, 2, "bn_relu"),
    ("conv5",    128, 128, 1, "bn_relu"),
    ("conv6_0",  128, 128, 1, "bn_relu"),
    ("conv6_1",  128, 128, 1, "bn_relu"),
    ("conv6_2",  128, 128, 1, "plain"),
]


def init_params(key):
    params = {}
    keys = jax.random.split(key, len(_CONV_DEFS) + 1)
    for (name, cin, cout, stride, mode), k in zip(_CONV_DEFS, keys[:-1]):
        fan_in = 9 * cin
        w = jax.random.normal(k, (3, 3, cin, cout), jnp.float32) * (2.0 / fan_in) ** 0.5
        params[name] = {"w": w, "stride": stride, "mode": mode}
    kc = keys[-1]
    params["clf_w"] = jax.random.normal(kc, (128, 2), jnp.float32) * 0.05
    params["clf_b"] = jnp.zeros((2,), jnp.float32)
    return params


# ----------------------------------------------------------------------------
# full forward
# ----------------------------------------------------------------------------
def darkfeat_forward(params, image_nchw, config=CONFIG):
    data = jnp.transpose(image_nchw, (0, 2, 3, 1)).astype(ACT_DTYPE)  # NHWC bf16
    B, H, W, _ = data.shape
    assert B == 1, "DarkFeat forward (like the PyTorch module) assumes batch=1"

    def cl(x, name):
        p = params[name]
        return conv_layer(x, p["w"], stride=p["stride"], mode=p["mode"])

    x0 = cl(data, "conv0")
    x1, x1_bn = cl(x0, "conv1")
    x2 = cl(x1_bn, "conv2")
    x3, x3_bn = cl(x2, "conv3")
    x4 = cl(x3_bn, "conv4")
    x5 = cl(x4, "conv5")
    x6_0 = cl(x5, "conv6_0")
    x6_1 = cl(x6_0, "conv6_1")
    x6_2 = cl(x6_1, "conv6_2")                           # (1, h6, w6, 128) f32

    comb_weights = jnp.array([1.0, 2.0, 3.0], jnp.float32)
    comb_weights = comb_weights / jnp.sum(comb_weights)
    dils = [3, 2, 1]
    det_score_map = jnp.zeros((B, H, W), jnp.float32)
    for idx, xx in enumerate([x1, x3, x6_2]):
        sm = peakiness_pallas(xx, dils[idx])             # (1, h, w) f32
        sm_up = bilinear_resize(sm, H, W)                # align_corners=True
        det_score_map = det_score_map + comb_weights[idx] * sm_up

    desc = x6_2
    conf = clf_conf_pallas(desc[0], params["clf_w"], params["clf_b"])  # (h6, w6)
    conf_up = bilinear_resize(conf[None], H, W)
    score_map = det_score_map * conf_up                  # (1, H, W)

    # ------------------------------------------------------------ extract_kpts
    masked = mask_pallas(score_map[0], config["score_thld"], config["edge_thld"],
                         config["nms_size"], config["eof_size"])
    k = min(config["kpt_n"], H * W)
    # TODO(synk): PyTorch keeps the dynamic number of mask-passing pixels
    # (torch.nonzero); fixed-k top_k on -inf-masked scores keeps shapes static,
    # so trailing entries may be masked (-inf) pixels.
    scores, flat_idx = jax.lax.top_k(masked.reshape(-1), k)   # already descending
    kpt_i = flat_idx // W
    kpt_j = flat_idx % W

    pos = jnp.stack([kpt_i, kpt_j], axis=-1).astype(jnp.float32) / 4.0
    descs = bilinear_gather(pos, desc[0])                # (k, 128)
    descs = descs / jnp.maximum(jnp.linalg.norm(descs, axis=-1, keepdims=True), 1e-12)

    kpts = jnp.stack([kpt_j, kpt_i], axis=-1).astype(jnp.float32) \
        * jnp.array([W / image_nchw.shape[3], H / image_nchw.shape[2]], jnp.float32)

    return {
        "keypoints": kpts,          # (k, 2) as (x=j, y=i)
        "scores": scores,           # (k,) descending
        "descriptors": descs.T,     # (128, k)
    }


# ----------------------------------------------------------------------------
if __name__ == "__main__":
    key = jax.random.PRNGKey(0)
    pkey, ikey = jax.random.split(key)
    params = init_params(pkey)
    # raw-demosaic input: (batch=1, channels=3, H=16, W=16)
    image = jax.random.uniform(ikey, (1, 3, 16, 16), jnp.float32)
    out = darkfeat_forward(params, image)
    out = jax.tree_util.tree_map(jax.block_until_ready, out)
    assert out["keypoints"].shape[1] == 2
    assert out["descriptors"].shape[0] == 128
    print("KERNEL_OK")
</pallas_src>

<mosaic_0001>
module attributes {stable_mosaic.version = 11 : i64} {
  func.func @kernel(%arg0: i32, %arg1: memref<256x27xbf16, #tpu.memory_space<vmem>>, %arg2: memref<27x32xbf16, #tpu.memory_space<vmem>>, %arg3: memref<256x32xbf16, #tpu.memory_space<vmem>>, %arg4: memref<1x2x32xf32, #tpu.memory_space<vmem>>) attributes {dimension_semantics = [#tpu.dimension_semantics<parallel>], iteration_bounds = array<i64: 1>, scalar_prefetch = 0 : i64, scratch_operands = 0 : i64, tpu.core_type = #tpu.core_type<tc>, window_params = [{transform_indices = @transform_0, window_bounds = array<i64: 256, 27>}, {pipeline_mode = #tpu.pipeline_mode<synchronous>, transform_indices = @transform_1, window_bounds = array<i64: 27, 32>}, {transform_indices = @transform_2, window_bounds = array<i64: 256, 32>}, {transform_indices = @transform_3, window_bounds = array<i64: 1, 2, 32>}]} {
    %c0 = arith.constant 0 : index
    %c0_0 = arith.constant 0 : index
    %0 = vector.load %arg1[%c0, %c0_0] : memref<256x27xbf16, #tpu.memory_space<vmem>>, vector<256x27xbf16>
    %c0_1 = arith.constant 0 : index
    %c0_2 = arith.constant 0 : index
    %1 = vector.load %arg2[%c0_1, %c0_2] : memref<27x32xbf16, #tpu.memory_space<vmem>>, vector<27x32xbf16>
    %cst = arith.constant dense<0.000000e+00> : vector<256x32xf32>
    %2 = tpu.matmul %0, %1, %cst {dimension_numbers = #tpu.dot_dimension_numbers<[1], [0], [0], [1], [0, 0, 1, 1], [], []>} : vector<256x27xbf16>, vector<27x32xbf16>, vector<256x32xf32> -> vector<256x32xf32>
    %3 = arith.truncf %2 : vector<256x32xf32> to vector<256x32xbf16>
    %c0_3 = arith.constant 0 : index
    %c0_4 = arith.constant 0 : index
    %4 = vector.load %arg3[%c0_3, %c0_4] : memref<256x32xbf16, #tpu.memory_space<vmem>>, vector<256x32xbf16>
    tpu.vector_store %arg3[%c0_3, %c0_4], %3 {strides = array<i32>} : memref<256x32xbf16, #tpu.memory_space<vmem>>, vector<256x32xbf16>,
    %cst_5 = arith.constant dense<0.000000e+00> : vector<32xf32>
    %5 = vector.multi_reduction <add>, %2, %cst_5 [0] : vector<256x32xf32> to vector<32xf32>
    %6 = vector.shape_cast %5 : vector<32xf32> to vector<1x32xf32>
    %7 = arith.mulf %2, %2 : vector<256x32xf32>
    %cst_6 = arith.constant dense<0.000000e+00> : vector<32xf32>
    %8 = vector.multi_reduction <add>, %7, %cst_6 [0] : vector<256x32xf32> to vector<32xf32>
    %9 = vector.shape_cast %8 : vector<32xf32> to vector<1x32xf32>
    %10 = tpu.concatenate %6, %9 in 0 : vector<1x32xf32>, vector<1x32xf32> -> vector<2x32xf32>
    %11 = vector.shape_cast %10 : vector<2x32xf32> to vector<1x2x32xf32>
    %c0_7 = arith.constant 0 : index
    %c0_8 = arith.constant 0 : index
    %c0_9 = arith.constant 0 : index
    %12 = vector.load %arg4[%c0_7, %c0_8, %c0_9] : memref<1x2x32xf32, #tpu.memory_space<vmem>>, vector<1x2x32xf32>
    tpu.vector_store %arg4[%c0_7, %c0_8, %c0_9], %11 {strides = array<i32>} : memref<1x2x32xf32, #tpu.memory_space<vmem>>, vector<1x2x32xf32>,
    return
  }
  func.func @transform_0(%arg0: i32) -> (i32, i32) {
    %c0_i32 = arith.constant 0 : i32
    %c0_i32_0 = arith.constant 0 : i32
    return %arg0, %c0_i32 : i32, i32
  }
  func.func @transform_1(%arg0: i32) -> (i32, i32) {
    %c0_i32 = arith.constant 0 : i32
    %c0_i32_0 = arith.constant 0 : i32
    %c0_i32_1 = arith.constant 0 : i32
    return %c0_i32, %c0_i32_0 : i32, i32
  }
  func.func @transform_2(%arg0: i32) -> (i32, i32) {
    %c0_i32 = arith.constant 0 : i32
    %c0_i32_0 = arith.constant 0 : i32
    return %arg0, %c0_i32 : i32, i32
  }
  func.func @transform_3(%arg0: i32) -> (i32, i32, i32) {
    %c0_i32 = arith.constant 0 : i32
    %c0_i32_0 = arith.constant 0 : i32
    %c0_i32_1 = arith.constant 0 : i32
    return %arg0, %c0_i32, %c0_i32_0 : i32, i32, i32
  }
}

</mosaic_0001>

<bundles_post_ra>
// kernel: tpu_custom_call.1
= control target key start
LH: loop header
LB: loop body
LE: loop exit
PB: predicated region body
PF: predicated region fallthrough
CT: control target
= control target key end

     0   :  { %vm191_vm0 = vcmask 1044480   ;;  %vm192_vm1 = vcmask 1045504   ;;  %v913_v2 = vmov 65535   ;;  %vm142_vm2 = vcmask 220160   ;;  %s1321_s0 = inlined_call_operand.vmem [shape: bf16[256,27], index: 0, kind: input, shape index: {}]   ;;  %s1322_s1 = inlined_call_operand.vmem [shape: bf16[27,32], index: 1, kind: input, shape index: {}]   ;;  %s1323_s2 = inlined_call_operand.vmem [shape: bf16[256,32], index: 2, kind: output, shape index: {0}]   ;;  %s1324_s3 = inlined_call_operand.hbm [shape: f32[1,2,32], index: 3, kind: output, shape index: {1}]  }
   0x1   :  { %v871_v0 = vld [vmem:[%s1322_s1] sm:$0xff]   ;;  %v872_v1 = vld [vmem:[%s1322_s1 + $0x8] sm:$0x3f]   ;;  %v193_v3 = vsel %vm191_vm0, 4294967295, %v913_v2  ;;  %v875_v8 = vld [vmem:[%s1321_s0 + $0x10] sm:$0xff]  }
   0x2   :  { %829 = vmatprep.subr.bf16.mxu0 %v871_v0  ;;  %865 = vmatprep.subr.bf16.mxu1 %v871_v0  ;;  %v873_v4 = vld [vmem:[%s1321_s0] sm:$0xff]   ;;  %v194_v5 = vsel %vm192_vm1, %v193_v3, 0  ;;  %v874_v7 = vld [vmem:[%s1321_s0 + $0x8] sm:$0xff]   ;;  %v883_v11 = vld [vmem:[%s1321_s0 + $0x50] sm:$0xff]  }
   0x3   :  { %830 = vmatpush3.bf16.msra.mxu0 %v871_v0  ;;  %867 = vmatpush3.bf16.msra.mxu1 %v871_v0  ;;  %v196_v6 = vand.u32 %v872_v1, %v194_v5  ;;  %v881_v9 = vld [vmem:[%s1321_s0 + $0x40] sm:$0xff]   ;;  %v882_v10 = vld [vmem:[%s1321_s0 + $0x48] sm:$0xff]   ;;  %v876_v12 = vld [vmem:[%s1321_s0 + $0x18] sm:$0xff]  }
   0x4   :  { %833 = vmatprep.mubr.msk.bf16.mxu0 %vm142_vm2, %v873_v4  ;;  %849 = vmatprep.mubr.msk.bf16.mxu1 %vm142_vm2, %v881_v9  ;;  %v877_v13 = vld [vmem:[%s1321_s0 + $0x20] sm:$0xff]   ;;  %v884_v14 = vld [vmem:[%s1321_s0 + $0x58] sm:$0xff]  }
   0x5   :  { %831 = vmatprep.subr.bf16.mxu0 %v196_v6  ;;  %866 = vmatprep.subr.bf16.mxu1 %v196_v6 }
   0x7   :  { %832 = vmatpush3.bf16.msra.mxu0 %v196_v6  ;;  %868 = vmatpush3.bf16.msra.mxu1 %v196_v6 }
   0xa   :  { %834 = vmatmul.mubr.msk.bf16.vlgmr.msra.gmra.mrb[0].mxu0 %vm142_vm2, %v874_v7  ;;  %850 = vmatmul.mubr.msk.bf16.vlgmr.msra.gmra.mrb[0].mxu1 %vm142_vm2, %v882_v10 }
   0xb   :  { %837 = vmatprep.mubr.msk.bf16.mxu0 %vm142_vm2, %v875_v8  ;;  %853 = vmatprep.mubr.msk.bf16.mxu1 %vm142_vm2, %v883_v11 }
   0xc   :  { %9 = vsyncpa [#allocation3], 0  ;;  %v885_v15 = vld [vmem:[%s1321_s0 + $0x60] sm:$0xff]   ;;  %v878_v16 = vld [vmem:[%s1321_s0 + $0x28] sm:$0xff]   ;;  %vm487_vm3 = vcmask 257024   ;;  %vm520_vm4 = vcmask 261120  }
   0xd   :  { %v879_v17 = vld [vmem:[%s1321_s0 + $0x30] sm:$0xff]   ;;  %v886_v18 = vld [vmem:[%s1321_s0 + $0x68] sm:$0xff]   ;;  %v880_v20 = vld [vmem:[%s1321_s0 + $0x38] sm:$0xff]   ;;  %vm691_vm5 = vcmask 1040384   ;;  %vm693_vm6 = vcmask 254976  }
   0xe   :  { %v887_v19 = vld [vmem:[%s1321_s0 + $0x70] sm:$0xff]   ;;  %v888_v21 = vld [vmem:[%s1321_s0 + $0x78] sm:$0xff]  }
  0x12   :  { %838 = vmatmul.mubr.msk.bf16.gmra.mrb[4].mxu0 %vm142_vm2, %v876_v12  ;;  %854 = vmatmul.mubr.msk.bf16.gmra.mrb[4].mxu1 %vm142_vm2, %v884_v14 }
  0x13   :  { %841 = vmatprep.mubr.msk.bf16.mxu0 %vm142_vm2, %v877_v13  ;;  %857 = vmatprep.mubr.msk.bf16.mxu1 %vm142_vm2, %v885_v15 }
  0x1a   :  { %842 = vmatmul.mubr.msk.bf16.gmra.mrb[8].mxu0 %vm142_vm2, %v878_v16  ;;  %858 = vmatmul.mubr.msk.bf16.gmra.mrb[8].mxu1 %vm142_vm2, %v886_v18 }
  0x1b   :  { %845 = vmatprep.mubr.msk.bf16.mxu0 %vm142_vm2, %v879_v17  ;;  %861 = vmatprep.mubr.msk.bf16.mxu1 %vm142_vm2, %v887_v19 }
  0x22   :  { %846 = vmatmul.mubr.msk.bf16.gmra.mrb[12].mxu0 %vm142_vm2, %v880_v20  ;;  %862 = vmatmul.mubr.msk.bf16.gmra.mrb[12].mxu1 %vm142_vm2, %v888_v21 }
  0xdd   :  { %v835_v22 = vpop.f32.mrb[0].mxu0  ;;  %v1009_v31 = vpop.f32.mrb[0].mxu1 }
  0xde   :  { %v781_v23 = vpack.c.bf16 %v835_v22, %v835_v22  ;;  %v232_v24 = vpop.f32.mrb[1].mxu0  ;;  %v592_v28 = vmul.f32 %v835_v22, %v835_v22  ;;  %v1017_v36 = vpop.f32.mrb[1].mxu1  ;;  %v797_v39 = vpack.c.bf16 %v1009_v31, %v1009_v31  ;;  %v524_v41 = vsel %vm520_vm4, %v835_v22, 0.0 }
  0xdf   :  { %v779_v25 = vpack.c.bf16 %v232_v24, %v232_v24  ;;  %v590_v26 = vmul.f32 %v232_v24, %v232_v24  ;;  %v836_v27 = vpop.f32.mrb[2].mxu0  ;;  %v521_v32 = vsel %vm520_vm4, %v232_v24, 0.0  ;;  %v1025_v40 = vpop.f32.mrb[2].mxu1  ;;  %v795_v44 = vpack.c.bf16 %v1017_v36, %v1017_v36 }
  0xe0   :  { %490 = vst.msk [vmem:[%s1323_s2 + $0x8] sm:$0xf] %vm487_vm3, %v781_v23  ;;  %v782_v29 = vpack.c.bf16 %v836_v27, %v836_v27  ;;  %v235_v30 = vpop.f32.mrb[3].mxu0  ;;  %v593_v37 = vmul.f32 %v836_v27, %v836_v27  ;;  %v1036_v45 = vpop.f32.mrb[3].mxu1  ;;  %506 = vst.msk [vmem:[%s1323_s2 + $0x48] sm:$0xf] %vm487_vm3, %v797_v39  ;;  %v798_v48 = vpack.c.bf16 %v1025_v40, %v1025_v40 }
  0xe1   :  { %488 = vst.msk [vmem:[%s1323_s2] sm:$0xf] %vm487_vm3, %v779_v25  ;;  %v780_v33 = vpack.c.bf16 %v235_v30, %v235_v30  ;;  %v522_v34 = vsel %vm520_vm4, %v235_v30, 0.0  ;;  %v591_v35 = vmul.f32 %v235_v30, %v235_v30  ;;  %v622_v42 = vsel %vm520_vm4, %v590_v26, 0.0  ;;  %504 = vst.msk [vmem:[%s1323_s2 + $0x40] sm:$0xf] %vm487_vm3, %v795_v44 }
  0xe2   :  { %491 = vst.msk [vmem:[%s1323_s2 + $0xc] sm:$0xf] %vm487_vm3, %v782_v29  ;;  %v523_v38 = vadd.f32 %v522_v34, %v521_v32  ;;  %v625_v49 = vsel %vm520_vm4, %v592_v28, 0.0  ;;  %v796_v51 = vpack.c.bf16 %v1036_v45, %v1036_v45  ;;  %v526_v52 = vsel %vm520_vm4, %v836_v27, 0.0  ;;  %507 = vst.msk [vmem:[%s1323_s2 + $0x4c] sm:$0xf] %vm487_vm3, %v798_v48 }
  0xe3   :  { %489 = vst.msk [vmem:[%s1323_s2 + $0x4] sm:$0xf] %vm487_vm3, %v780_v33  ;;  %v623_v43 = vsel %vm520_vm4, %v591_v35, 0.0  ;;  %v627_v53 = vsel %vm520_vm4, %v593_v37, 0.0 }
  0xe4   :  { %v525_v46 = vadd.f32 %v524_v41, %v523_v38  ;;  %v624_v47 = vadd.f32 %v623_v43, %v622_v42  ;;  %505 = vst.msk [vmem:[%s1323_s2 + $0x44] sm:$0xf] %vm487_vm3, %v796_v51 }
  0xe5   :  { %v839_v50 = vpop.f32.mrb[4].mxu0  ;;  %v1066_v1 = vpop.f32.mrb[4].mxu1 }
  0xe6   :  { %v626_v54 = vadd.f32 %v625_v49, %v624_v47  ;;  %v785_v55 = vpack.c.bf16 %v839_v50, %v839_v50  ;;  %v248_v56 = vpop.f32.mrb[5].mxu0  ;;  %v527_v58 = vadd.f32 %v526_v52, %v525_v46  ;;  %v1073_v5 = vpop.f32.mrb[5].mxu1  ;;  %v596_v6 = vmul.f32 %v839_v50, %v839_v50 }
  0xe7   :  { %v783_v57 = vpack.c.bf16 %v248_v56, %v248_v56  ;;  %v528_v59 = vsel %vm520_vm4, %v248_v56, 0.0  ;;  %v594_v60 = vmul.f32 %v248_v56, %v248_v56  ;;  %v840_v61 = vpop.f32.mrb[6].mxu0  ;;  %v1080_v10 = vpop.f32.mrb[6].mxu1  ;;  %v532_v13 = vsel %vm520_vm4, %v839_v50, 0.0 }
  0xe8   :  { %494 = vst.msk [vmem:[%s1323_s2 + $0x18] sm:$0xf] %vm487_vm3, %v785_v55  ;;  %v628_v62 = vadd.f32 %v627_v53, %v626_v54  ;;  %v786_v63 = vpack.c.bf16 %v840_v61, %v840_v61  ;;  %v251_v0 = vpop.f32.mrb[7].mxu0  ;;  %v529_v2 = vadd.f32 %v528_v59, %v527_v58  ;;  %v1086_v12 = vpop.f32.mrb[7].mxu1  ;;  %v597_v14 = vmul.f32 %v840_v61, %v840_v61 }
  0xe9   :  { %492 = vst.msk [vmem:[%s1323_s2 + $0x10] sm:$0xf] %vm487_vm3, %v783_v57  ;;  %v629_v3 = vsel %vm520_vm4, %v594_v60, 0.0  ;;  %v784_v4 = vpack.c.bf16 %v251_v0, %v251_v0  ;;  %v530_v8 = vsel %vm520_vm4, %v251_v0, 0.0  ;;  %v595_v9 = vmul.f32 %v251_v0, %v251_v0 }
  0xea   :  { %v630_v7 = vadd.f32 %v629_v3, %v628_v62  ;;  %495 = vst.msk [vmem:[%s1323_s2 + $0x1c] sm:$0xf] %vm487_vm3, %v786_v63  ;;  %v531_v11 = vadd.f32 %v530_v8, %v529_v2  ;;  %v801_v16 = vpack.c.bf16 %v1066_v1, %v1066_v1  ;;  %v799_v20 = vpack.c.bf16 %v1073_v5, %v1073_v5 }
  0xeb   :  { %493 = vst.msk [vmem:[%s1323_s2 + $0x14] sm:$0xf] %vm487_vm3, %v784_v4  ;;  %v631_v15 = vsel %vm520_vm4, %v595_v9, 0.0  ;;  %v633_v21 = vsel %vm520_vm4, %v596_v6, 0.0  ;;  %v534_v22 = vsel %vm520_vm4, %v840_v61, 0.0  ;;  %v635_v30 = vsel %vm520_vm4, %v597_v14, 0.0 }
  0xec   :  { %v533_v17 = vadd.f32 %v532_v13, %v531_v11  ;;  %v632_v18 = vadd.f32 %v631_v15, %v630_v7  ;;  %510 = vst.msk [vmem:[%s1323_s2 + $0x58] sm:$0xf] %vm487_vm3, %v801_v16  ;;  %508 = vst.msk [vmem:[%s1323_s2 + $0x50] sm:$0xf] %vm487_vm3, %v799_v20  ;;  %v802_v54 = vpack.c.bf16 %v1080_v10, %v1080_v10 }
  0xed   :  { %v843_v19 = vpop.f32.mrb[8].mxu0  ;;  %v1110_v35 = vpop.f32.mrb[8].mxu1  ;;  %v800_v58 = vpack.c.bf16 %v1086_v12, %v1086_v12 }
  0xee   :  { %v789_v23 = vpack.c.bf16 %v843_v19, %v843_v19  ;;  %v264_v24 = vpop.f32.mrb[9].mxu0  ;;  %v634_v25 = vadd.f32 %v633_v21, %v632_v18  ;;  %v535_v27 = vadd.f32 %v534_v22, %v533_v17  ;;  %v1116_v41 = vpop.f32.mrb[9].mxu1  ;;  %v600_v42 = vmul.f32 %v843_v19, %v843_v19  ;;  %511 = vst.msk [vmem:[%s1323_s2 + $0x5c] sm:$0xf] %vm487_vm3, %v802_v54 }
  0xef   :  { %v787_v26 = vpack.c.bf16 %v264_v24, %v264_v24  ;;  %v536_v28 = vsel %vm520_vm4, %v264_v24, 0.0  ;;  %v844_v29 = vpop.f32.mrb[10].mxu0  ;;  %v598_v32 = vmul.f32 %v264_v24, %v264_v24  ;;  %v1124_v47 = vpop.f32.mrb[10].mxu1  ;;  %v540_v51 = vsel %vm520_vm4, %v843_v19, 0.0  ;;  %509 = vst.msk [vmem:[%s1323_s2 + $0x54] sm:$0xf] %vm487_vm3, %v800_v58 }
  0xf0   :  { %498 = vst.msk [vmem:[%s1323_s2 + $0x28] sm:$0xf] %vm487_vm3, %v789_v23  ;;  %v790_v33 = vpack.c.bf16 %v844_v29, %v844_v29  ;;  %v267_v34 = vpop.f32.mrb[11].mxu0  ;;  %v537_v37 = vadd.f32 %v536_v28, %v535_v27  ;;  %v636_v38 = vadd.f32 %v635_v30, %v634_v25  ;;  %v1130_v50 = vpop.f32.mrb[11].mxu1  ;;  %v601_v52 = vmul.f32 %v844_v29, %v844_v29 }
  0xf1   :  { %496 = vst.msk [vmem:[%s1323_s2 + $0x20] sm:$0xf] %vm487_vm3, %v787_v26  ;;  %v788_v39 = vpack.c.bf16 %v267_v34, %v267_v34  ;;  %v637_v43 = vsel %vm520_vm4, %v598_v32, 0.0  ;;  %v538_v44 = vsel %vm520_vm4, %v267_v34, 0.0  ;;  %v599_v46 = vmul.f32 %v267_v34, %v267_v34 }
  0xf2   :  { %499 = vst.msk [vmem:[%s1323_s2 + $0x2c] sm:$0xf] %vm487_vm3, %v790_v33  ;;  %v638_v48 = vadd.f32 %v637_v43, %v636_v38  ;;  %v539_v49 = vadd.f32 %v538_v44, %v537_v37  ;;  %v641_v59 = vsel %vm520_vm4, %v600_v42, 0.0  ;;  %v542_v60 = vsel %vm520_vm4, %v844_v29, 0.0 }
  0xf3   :  { %497 = vst.msk [vmem:[%s1323_s2 + $0x24] sm:$0xf] %vm487_vm3, %v788_v39  ;;  %v639_v53 = vsel %vm520_vm4, %v599_v46, 0.0  ;;  %v643_v6 = vsel %vm520_vm4, %v601_v52, 0.0  ;;  %v606_v24 = vmul.f32 %v1017_v36, %v1017_v36  ;;  %v805_v29 = vpack.c.bf16 %v1110_v35, %v1110_v35 }
  0xf4   :  { %v541_v55 = vadd.f32 %v540_v51, %v539_v49  ;;  %v640_v56 = vadd.f32 %v639_v53, %v638_v48  ;;  %v803_v33 = vpack.c.bf16 %v1116_v41, %v1116_v41  ;;  %v552_v38 = vsel %vm520_vm4, %v1017_v36, 0.0 }
  0xf5   :  { %v847_v57 = vpop.f32.mrb[12].mxu0  ;;  %v1154_v11 = vpop.f32.mrb[12].mxu1  ;;  %514 = vst.msk [vmem:[%s1323_s2 + $0x68] sm:$0xf] %vm487_vm3, %v805_v29  ;;  %v806_v39 = vpack.c.bf16 %v1124_v47, %v1124_v47  ;;  %v653_v46 = vsel %vm520_vm4, %v606_v24, 0.0  ;;  %v607_v36 = vmul.f32 %v1036_v45, %v1036_v45  ;;  %v804_v48 = vpack.c.bf16 %v1130_v50, %v1130_v50 }
  0xf6   :  { %v793_v61 = vpack.c.bf16 %v847_v57, %v847_v57  ;;  %v280_v62 = vpop.f32.mrb[13].mxu0  ;;  %v642_v63 = vadd.f32 %v641_v59, %v640_v56  ;;  %v543_v2 = vadd.f32 %v542_v60, %v541_v55  ;;  %v1160_v16 = vpop.f32.mrb[13].mxu1  ;;  %v604_v17 = vmul.f32 %v847_v57, %v847_v57  ;;  %512 = vst.msk [vmem:[%s1323_s2 + $0x60] sm:$0xf] %vm487_vm3, %v803_v33 }
  0xf7   :  { %v791_v0 = vpack.c.bf16 %v280_v62, %v280_v62  ;;  %v544_v3 = vsel %vm520_vm4, %v280_v62, 0.0  ;;  %v848_v4 = vpop.f32.mrb[14].mxu0  ;;  %v602_v7 = vmul.f32 %v280_v62, %v280_v62  ;;  %v1168_v21 = vpop.f32.mrb[14].mxu1  ;;  %v548_v26 = vsel %vm520_vm4, %v847_v57, 0.0  ;;  %515 = vst.msk [vmem:[%s1323_s2 + $0x6c] sm:$0xf] %vm487_vm3, %v806_v39 }
  0xf8   :  { %502 = vst.msk [vmem:[%s1323_s2 + $0x38] sm:$0xf] %vm487_vm3, %v793_v61  ;;  %v794_v8 = vpack.c.bf16 %v848_v4, %v848_v4  ;;  %v283_v9 = vpop.f32.mrb[15].mxu0  ;;  %v545_v13 = vadd.f32 %v544_v3, %v543_v2  ;;  %v644_v14 = vadd.f32 %v643_v6, %v642_v63  ;;  %v1176_v25 = vpop.f32.mrb[15].mxu1  ;;  %v605_v27 = vmul.f32 %v848_v4, %v848_v4 }
  0xf9   :  { %500 = vst.msk [vmem:[%s1323_s2 + $0x30] sm:$0xf] %vm487_vm3, %v791_v0  ;;  %v792_v15 = vpack.c.bf16 %v283_v9, %v283_v9  ;;  %v645_v18 = vsel %vm520_vm4, %v602_v7, 0.0  ;;  %v546_v19 = vsel %vm520_vm4, %v283_v9, 0.0  ;;  %v603_v20 = vmul.f32 %v283_v9, %v283_v9  ;;  %513 = vst.msk [vmem:[%s1323_s2 + $0x64] sm:$0xf] %vm487_vm3, %v804_v48 }
  0xfa   :  { %503 = vst.msk [vmem:[%s1323_s2 + $0x3c] sm:$0xf] %vm487_vm3, %v794_v8  ;;  %v646_v22 = vadd.f32 %v645_v18, %v644_v14  ;;  %v547_v23 = vadd.f32 %v546_v19, %v545_v13  ;;  %v649_v34 = vsel %vm520_vm4, %v604_v17, 0.0  ;;  %v550_v37 = vsel %vm520_vm4, %v848_v4, 0.0 }
  0xfb   :  { %501 = vst.msk [vmem:[%s1323_s2 + $0x34] sm:$0xf] %vm487_vm3, %v792_v15  ;;  %v647_v28 = vsel %vm520_vm4, %v603_v20, 0.0  ;;  %v651_v44 = vsel %vm520_vm4, %v605_v27, 0.0  ;;  %v809_v52 = vpack.c.bf16 %v1154_v11, %v1154_v11  ;;  %v608_v53 = vmul.f32 %v1009_v31, %v1009_v31 }
  0xfc   :  { %v549_v30 = vadd.f32 %v548_v26, %v547_v23  ;;  %v648_v32 = vadd.f32 %v647_v28, %v646_v22  ;;  %v554_v54 = vsel %vm520_vm4, %v1036_v45, 0.0  ;;  %v807_v55 = vpack.c.bf16 %v1160_v16, %v1160_v16 }
  0xfd   :  { %v556_v56 = vsel %vm520_vm4, %v1009_v31, 0.0  ;;  %518 = vst.msk [vmem:[%s1323_s2 + $0x78] sm:$0xf] %vm487_vm3, %v809_v52  ;;  %v609_v45 = vmul.f32 %v1025_v40, %v1025_v40  ;;  %v655_v59 = vsel %vm520_vm4, %v607_v36, 0.0  ;;  %v610_v60 = vmul.f32 %v1073_v5, %v1073_v5 }
  0xfe   :  { %v650_v42 = vadd.f32 %v649_v34, %v648_v32  ;;  %v551_v43 = vadd.f32 %v550_v37, %v549_v30  ;;  %516 = vst.msk [vmem:[%s1323_s2 + $0x70] sm:$0xf] %vm487_vm3, %v807_v55  ;;  %v810_v31 = vpack.c.bf16 %v1168_v21, %v1168_v21  ;;  %v808_v63 = vpack.c.bf16 %v1176_v25, %v1176_v25 }
  0xff   :  { %v657_v0 = vsel %vm520_vm4, %v608_v53, 0.0  ;;  %v558_v2 = vsel %vm520_vm4, %v1025_v40, 0.0  ;;  %v560_v3 = vsel %vm520_vm4, %v1073_v5, 0.0  ;;  %v659_v7 = vsel %vm520_vm4, %v609_v45, 0.0 }
 0x100   :  { %v553_v49 = vadd.f32 %v552_v38, %v551_v43  ;;  %v652_v51 = vadd.f32 %v651_v44, %v650_v42  ;;  %519 = vst.msk [vmem:[%s1323_s2 + $0x7c] sm:$0xf] %vm487_vm3, %v810_v31  ;;  %517 = vst.msk [vmem:[%s1323_s2 + $0x74] sm:$0xf] %vm487_vm3, %v808_v63  ;;  %v661_v8 = vsel %vm520_vm4, %v610_v60, 0.0  ;;  %v611_v40 = vmul.f32 %v1086_v12, %v1086_v12  ;;  %s914_s2 = smov [#allocation2]  }
 0x101   :  { %v612_v13 = vmul.f32 %v1066_v1, %v1066_v1  ;;  %v562_v14 = vsel %vm520_vm4, %v1086_v12, 0.0  ;;  %v564_v18 = vsel %vm520_vm4, %v1066_v1, 0.0  ;;  %v613_v19 = vmul.f32 %v1080_v10, %v1080_v10  ;;  %s703_s24 = sshll.u32 %s914_s2, 4  ;;  %s704_s24 = int_to_ptr.vmem [resolvable:$true] %s703_s24 }
 0x102   :  { %v654_v57 = vadd.f32 %v653_v46, %v652_v51  ;;  %v555_v58 = vadd.f32 %v554_v54, %v553_v49  ;;  %v663_v20 = vsel %vm520_vm4, %v611_v40, 0.0  ;;  %v614_v22 = vmul.f32 %v1116_v41, %v1116_v41  ;;  %s889_s25 = scalar_lea.vmem %s704_s24, 32  ;;  %p894_p1 = scmp.lt.s32.totalorder %s704_s24, %s704_s24 }
 0x103   :  { %v665_v26 = vsel %vm520_vm4, %v612_v13, 0.0  ;;  %v566_v12 = vsel %vm520_vm4, %v1080_v10, 0.0  ;;  %v568_v27 = vsel %vm520_vm4, %v1116_v41, 0.0  ;;  %v667_v29 = vsel %vm520_vm4, %v613_v19, 0.0  ;;  %p890_p0 = scmp.ne.s32.totalorder %s704_s24, %s889_s25  ;;  %p895_p2 = scmp.lt.s32.totalorder %s889_s25, %s889_s25 }
 0x104   :  { %v557_v61 = vadd.f32 %v556_v56, %v555_v58  ;;  %v656_v62 = vadd.f32 %v655_v59, %v654_v57  ;;  %v669_v30 = vsel %vm520_vm4, %v614_v22, 0.0  ;;  %v615_v32 = vmul.f32 %v1130_v50, %v1130_v50 }
 0x105   :  { %v616_v37 = vmul.f32 %v1110_v35, %v1110_v35  ;;  %v570_v10 = vsel %vm520_vm4, %v1130_v50, 0.0  ;;  %v572_v41 = vsel %vm520_vm4, %v1110_v35, 0.0  ;;  %v617_v42 = vmul.f32 %v1124_v47, %v1124_v47  ;;  %p896_p3 = por %p895_p2, %p894_p1 }
 0x106   :  { %v658_v4 = vadd.f32 %v657_v0, %v656_v62  ;;  %v559_v6 = vadd.f32 %v558_v2, %v557_v61  ;;  %v671_v43 = vsel %vm520_vm4, %v615_v32, 0.0  ;;  %v618_v44 = vmul.f32 %v1160_v16, %v1160_v16 }
 0x107   :  { %v673_v48 = vsel %vm520_vm4, %v616_v37, 0.0  ;;  %v574_v50 = vsel %vm520_vm4, %v1124_v47, 0.0  ;;  %v576_v49 = vsel %vm520_vm4, %v1160_v16, 0.0  ;;  %v675_v52 = vsel %vm520_vm4, %v617_v42, 0.0  ;;  %p897_p4 = pnand %p896_p3, %p890_p0 }
 0x108   :  { %v561_v5 = vadd.f32 %v560_v3, %v559_v6  ;;  %v660_v9 = vadd.f32 %v659_v7, %v658_v4  ;;  %v677_v53 = vsel %vm520_vm4, %v618_v44, 0.0  ;;  %v619_v54 = vmul.f32 %v1176_v25, %v1176_v25 }
 0x109   :  { %v620_v57 = vmul.f32 %v1154_v11, %v1154_v11  ;;  %v578_v47 = vsel %vm520_vm4, %v1176_v25, 0.0  ;;  %v580_v16 = vsel %vm520_vm4, %v1154_v11, 0.0  ;;  %v621_v59 = vmul.f32 %v1168_v21, %v1168_v21 }
 0x10a   :  { %v662_v15 = vadd.f32 %v661_v8, %v660_v9  ;;  %v563_v17 = vadd.f32 %v562_v14, %v561_v5  ;;  %v679_v60 = vsel %vm520_vm4, %v619_v54, 0.0  ;;  %v582_v63 = vsel %vm520_vm4, %v1168_v21, 0.0 }
 0x10b   :  { %v681_v62 = vsel %vm520_vm4, %v620_v57, 0.0  ;;  %v683_v25 = vsel %vm520_vm4, %v621_v59, 0.0 }
 0x10c   :  { %v565_v23 = vadd.f32 %v564_v18, %v563_v17  ;;  %v664_v24 = vadd.f32 %v663_v20, %v662_v15 }
 0x10e   :  { %v666_v28 = vadd.f32 %v665_v26, %v664_v24  ;;  %v567_v1 = vadd.f32 %v566_v12, %v565_v23 }
 0x110   :  { %v569_v33 = vadd.f32 %v568_v27, %v567_v1  ;;  %v668_v34 = vadd.f32 %v667_v29, %v666_v28 }
 0x112   :  { %v670_v38 = vadd.f32 %v669_v30, %v668_v34  ;;  %v571_v39 = vadd.f32 %v570_v10, %v569_v33 }
 0x114   :  { %v573_v46 = vadd.f32 %v572_v41, %v571_v39  ;;  %v672_v36 = vadd.f32 %v671_v43, %v670_v38 }
 0x116   :  { %v674_v51 = vadd.f32 %v673_v48, %v672_v36  ;;  %v575_v35 = vadd.f32 %v574_v50, %v573_v46 }
 0x118   :  { %v577_v55 = vadd.f32 %v576_v49, %v575_v35  ;;  %v676_v56 = vadd.f32 %v675_v52, %v674_v51 }
 0x11a   :  { %v678_v58 = vadd.f32 %v677_v53, %v676_v56  ;;  %v579_v45 = vadd.f32 %v578_v47, %v577_v55 }
 0x11c   :  { %v581_v31 = vadd.f32 %v580_v16, %v579_v45  ;;  %v680_v61 = vadd.f32 %v679_v60, %v678_v58 }
 0x11e   :  { %v583_v0 = vadd.f32 %v582_v63, %v581_v31  ;;  %v682_v2 = vadd.f32 %v681_v62, %v680_v61 }
 0x120   :  { %v584_v3 = vrot.slane %v583_v0, 4  ;;  %v684_v4 = vadd.f32 %v683_v25, %v682_v2 }
 0x122   :  { %v585_v6 = vadd.f32 %v584_v3, %v583_v0  ;;  %v685_v11 = vrot.slane %v684_v4, 4 }
 0x124   :  { %v586_v7 = vrot.slane %v585_v6, 2  ;;  %v686_v8 = vadd.f32 %v685_v11, %v684_v4 }
 0x126   :  { %v587_v40 = vadd.f32 %v586_v7, %v585_v6  ;;  %v687_v5 = vrot.slane %v686_v8, 2 }
 0x128   :  { %v588_v9 = vrot.slane %v587_v40, 1  ;;  %v688_v13 = vadd.f32 %v687_v5, %v686_v8 }
 0x12a   :  { %v689_v14 = vrot.slane %v688_v13, 1  ;;  %v589_v15 = vadd.f32 %v588_v9, %v587_v40 }
 0x12c   :  { %v690_v21 = vadd.f32 %v689_v14, %v688_v13 }
 0x12e   :  { %v692_v17 = vsel %vm691_vm5, %v589_v15, %v690_v21 }
 0x12f   :  { %694 = vst.msk [vmem:[#allocation2] sm:$0x3] %vm693_vm6, %v692_v17 }
 0x130   :  { %900 = shalt.err (!%p897_p4)
}
 0x131   :  { %s901_s28 = scalar_lea.hbm %s1324_s3, 32 }
 0x132   :  { %p902_p5 = scmp.ne.s32.totalorder %s1324_s3, %s901_s28  ;;  %p905_p6 = scmp.lt.u32.totalorder %s901_s28, %s1324_s3 }
 0x134   :  { %p907_p7 = pnand %p905_p6, %p902_p5 }
 0x136   :  { %910 = shalt.err (!%p907_p7)
}
 0x137   :  { %706 = dma.vmem_to_hbm [thread:$0]  %s704_s24, 32, %s1324_s3, [#allocation3]  }
 0x138   :  { %911 = dma.done.wait [#allocation3], 32  }
 0x139   :  { %912 = vsyncadd [#allocation3], 4294967264 }
 0x13a   :  { %712 = vsyncpa [#allocation3], 1 }

</bundles_post_ra>
